<compile_context>
chip_gen: v7x
topology: tpu7x:2x2x1
jax: 0.10.0
libtpu: 0.0.40
codegen_flags: <defaults>
</compile_context>

<pallas_src>
import functools

import jax
import jax.numpy as jnp
from jax import lax
from jax.experimental import pallas as pl
from jax.experimental.pallas import tpu as pltpu


def _pool_kernel(x_ref, o_ref, *, kh, kw, sh, sw, W, Wo):
    """OR-pool (max) one block of images.

    x_ref: (tnc, H*W)   -- each row is one (n, c) image, spatial flattened.
    o_ref: (tnc, Ho*Wo) -- pooled outputs, same row <-> image mapping.

    For each window tap (ky, kx) a constant one-hot matrix selects the tap's
    input element for every output position; the (tnc, H*W) @ (H*W, Ho*Wo)
    matmul runs on the MXU, which is idle in this bandwidth-bound kernel.
    """
    x = x_ref[...]                                   # (tnc, in_len)
    in_len = x.shape[-1]
    out_len = o_ref.shape[-1]

    def div_c(a, d):  # floor-div of a non-negative i32 array by a constant
        return (a >> (d.bit_length() - 1)) if (d & (d - 1)) == 0 else a // d

    # Decompose flat input / output indices once (hoisted out of the tap loop).
    ii = lax.broadcasted_iota(jnp.int32, (in_len, out_len), 0)
    oo = lax.broadcasted_iota(jnp.int32, (in_len, out_len), 1)
    h_in = div_c(ii, W)
    w_in = ii - h_in * W
    ho = div_c(oo, Wo)
    wo = oo - ho * Wo
    h_base = ho * sh
    w_base = wo * sw

    out = None
    for ky in range(kh):                              # static, unrolled taps
        h_eq = h_in == h_base + ky
        for kx in range(kw):
            sel = (h_eq & (w_in == w_base + kx)).astype(x.dtype)  # one-hot
            tap = jnp.dot(x, sel, preferred_element_type=jnp.float32)
            out = tap if out is None else jnp.maximum(out, tap)
    o_ref[...] = out.astype(o_ref.dtype)


def pool_logic_layer(x, kernel=2, stride=2, return_indices=False):
    """JAX/Pallas equivalent of PoolLogicLayer.forward (NCHW in, NCHW out)."""
    kh, kw = (kernel, kernel) if isinstance(kernel, int) else tuple(kernel)
    sh, sw = (stride, stride) if isinstance(stride, int) else tuple(stride)

    if x.ndim == 5:
        if x.shape[4] != 1:
            raise ValueError(f"Expected last dim=1, got {x.shape[4]}")
        x = x.reshape(x.shape[0], x.shape[1], x.shape[2], x.shape[3])
    elif x.ndim != 4:
        raise ValueError("Input must be 4D or 5D")

    if return_indices:
        # TODO(synk): flat H*W argmax indices (torch return_indices=True).
        raise NotImplementedError("return_indices=True not supported")

    N, C, H, W = x.shape
    Ho = (H - kh) // sh + 1
    Wo = (W - kw) // sw + 1
    if Ho <= 0 or Wo <= 0:
        raise ValueError("Pooling window larger than input")
    NC = N * C
    in_len = H * W
    out_len = Ho * Wo
    ebytes = jnp.dtype(x.dtype).itemsize

    # Free (metadata-only) reshape: NCHW bytes stay put in HBM.
    x_flat = x.reshape(NC, in_len)

    # Generation-aware VMEM budget (v5e/v6e: 128 MiB physical -> 64 MiB limit;
    # v7x: 64 MiB physical -> 48 MiB limit), ~25% headroom for temporaries.
    try:
        vmem_cap = pltpu.get_tpu_info().vmem_capacity_bytes
    except Exception:  # conservative default that is safe on every generation
        vmem_cap = 64 * 1024 * 1024
    vmem_limit = min(64 * 1024 * 1024, (int(vmem_cap) * 3) // 4)
    block_budget = (vmem_limit * 3) // 4
    # In-kernel temporaries: two i32 index planes + one one-hot matrix.
    aux_bytes = in_len * out_len * (2 * 4 + ebytes)
    io_budget = block_budget - 2 * aux_bytes
    # ~3x per image: double-buffered HBM<->VMEM blocks plus in-kernel copies.
    per_img = 3 * (in_len + out_len) * ebytes
    tnc_cap = io_budget // per_img if io_budget > 0 else 0

    min_tnc = min(NC, 8)
    if tnc_cap < min_tnc:
        # TODO(synk): tile Ho across the grid (no halo when kernel <= stride)
        # for very large spatial maps instead of failing.
        raise NotImplementedError(
            f"spatial map too large for a single VMEM block: H*W={in_len}")

    if NC <= 8:
        tnc = NC                                    # one full (legal) block
    else:
        tnc = max(8, min(NC, (tnc_cap // 8) * 8))   # sublane-aligned tile
        # Prefer >= 2 (ideally 4) grid blocks so both v7x TensorCores get work,
        # as long as each step still moves >= ~1 MiB of HBM traffic (per-step
        # fixed overhead ~0.35 us is negligible above that even at 3.2 TB/s).
        step_img_bytes = (in_len + out_len) * ebytes
        for parts in (4, 2):
            cand = pl.cdiv(NC, parts)
            cand = pl.cdiv(cand, 8) * 8
            if cand < tnc and cand * step_img_bytes >= (1 << 20):
                tnc = cand
                break

    grid = (pl.cdiv(NC, tnc),)

    kern = functools.partial(_pool_kernel, kh=kh, kw=kw, sh=sh, sw=sw, W=W, Wo=Wo)

    out_flat = pl.pallas_call(
        kern,
        out_shape=jax.ShapeDtypeStruct((NC, out_len), x.dtype),
        grid=grid,
        in_specs=[pl.BlockSpec((tnc, in_len), lambda i: (i, 0))],
        out_specs=pl.BlockSpec((tnc, out_len), lambda i: (i, 0)),
        compiler_params=pltpu.CompilerParams(
            dimension_semantics=("parallel",),
            vmem_limit_bytes=int(vmem_limit),
        ),
        cost_estimate=pl.CostEstimate(
            flops=2 * NC * out_len * in_len * kh * kw,
            transcendentals=0,
            bytes_accessed=NC * (in_len + out_len) * ebytes,
        ),
    )(x_flat)

    # Free reshape back to NCHW.
    return out_flat.reshape(N, C, Ho, Wo)


def _reference_pool(x, kernel=2, stride=2):
    kh, kw = (kernel, kernel) if isinstance(kernel, int) else tuple(kernel)
    sh, sw = (stride, stride) if isinstance(stride, int) else tuple(stride)
    init = jnp.array(-jnp.inf, dtype=x.dtype)
    return lax.reduce_window(
        x, init, lax.max,
        window_dimensions=(1, 1, kh, kw),
        window_strides=(1, 1, sh, sw),
        padding="VALID",
    )


if __name__ == "__main__":
    key = jax.random.PRNGKey(0)
    k0, k1, k2 = jax.random.split(key, 3)

    # Logic-gate-style activations in [0, 1]; small NCHW shapes.
    x = jax.random.uniform(k0, (2, 4, 16, 16), dtype=jnp.float32)

    y = jax.block_until_ready(pool_logic_layer(x, kernel=2, stride=2))
    y_ref = _reference_pool(x, 2, 2)
    assert y.shape == (2, 4, 8, 8), y.shape
    assert jnp.allclose(y, y_ref), "Pallas pooling mismatch (2x2/2, f32)"

    # 5-D input path (trailing singleton dim).
    y5 = jax.block_until_ready(pool_logic_layer(x[..., None]))
    assert jnp.allclose(y5, y_ref)

    # Wider channel count (bigger image-parallel blocks).
    xb = jax.random.uniform(k1, (2, 96, 16, 16), dtype=jnp.float32)
    yb = jax.block_until_ready(pool_logic_layer(xb))
    assert yb.shape == (2, 96, 8, 8), yb.shape
    assert jnp.allclose(yb, _reference_pool(xb, 2, 2)), "mismatch (wide)"

    # bf16 passes straight through (max-pooling is exact under bf16).
    xh = xb.astype(jnp.bfloat16)
    yh = jax.block_until_ready(pool_logic_layer(xh))
    assert yh.dtype == jnp.bfloat16
    assert jnp.allclose(yh.astype(jnp.float32),
                        _reference_pool(xh, 2, 2).astype(jnp.float32)), "mismatch (bf16)"

    # Overlapping windows (kernel > stride) are also handled by the same path.
    xo = jax.random.uniform(k2, (2, 4, 16, 16), dtype=jnp.float32)
    yo = jax.block_until_ready(pool_logic_layer(xo, kernel=3, stride=2))
    assert yo.shape == (2, 4, 7, 7), yo.shape
    assert jnp.allclose(yo, _reference_pool(xo, 3, 2)), "mismatch (3x3/2)"

    print("KERNEL_OK")
</pallas_src>

<mosaic_0001>
module attributes {stable_mosaic.version = 11 : i64} {
  func.func @_pool_kernel(%arg0: i32, %arg1: memref<8x256xf32, #tpu.memory_space<vmem>>, %arg2: memref<8x64xf32, #tpu.memory_space<vmem>>) attributes {dimension_semantics = [#tpu.dimension_semantics<parallel>], iteration_bounds = array<i64: 1>, scalar_prefetch = 0 : i64, scratch_operands = 0 : i64, tpu.core_type = #tpu.core_type<tc>, window_params = [{transform_indices = @transform_0, window_bounds = array<i64: 8, 256>}, {transform_indices = @transform_1, window_bounds = array<i64: 8, 64>}]} {
    %c0 = arith.constant 0 : index
    %c0_0 = arith.constant 0 : index
    %0 = vector.load %arg1[%c0, %c0_0] : memref<8x256xf32, #tpu.memory_space<vmem>>, vector<8x256xf32>
    %1 = tpu.iota {dimensions = array<i32: 0>} : vector<256x64xi32>
    %2 = tpu.iota {dimensions = array<i32: 1>} : vector<256x64xi32>
    %c4_i32 = arith.constant 4 : i32
    %3 = vector.broadcast %c4_i32 : i32 to vector<256x64xi32>
    %4 = arith.shrsi %1, %3 : vector<256x64xi32>
    %c16_i32 = arith.constant 16 : i32
    %5 = vector.broadcast %c16_i32 : i32 to vector<256x64xi32>
    %6 = arith.muli %4, %5 : vector<256x64xi32>
    %7 = arith.subi %1, %6 : vector<256x64xi32>
    %c3_i32 = arith.constant 3 : i32
    %8 = vector.broadcast %c3_i32 : i32 to vector<256x64xi32>
    %9 = arith.shrsi %2, %8 : vector<256x64xi32>
    %c8_i32 = arith.constant 8 : i32
    %10 = vector.broadcast %c8_i32 : i32 to vector<256x64xi32>
    %11 = arith.muli %9, %10 : vector<256x64xi32>
    %12 = arith.subi %2, %11 : vector<256x64xi32>
    %c2_i32 = arith.constant 2 : i32
    %13 = vector.broadcast %c2_i32 : i32 to vector<256x64xi32>
    %14 = arith.muli %9, %13 : vector<256x64xi32>
    %c2_i32_1 = arith.constant 2 : i32
    %15 = vector.broadcast %c2_i32_1 : i32 to vector<256x64xi32>
    %16 = arith.muli %12, %15 : vector<256x64xi32>
    %c0_i32 = arith.constant 0 : i32
    %17 = vector.broadcast %c0_i32 : i32 to vector<256x64xi32>
    %18 = arith.addi %14, %17 : vector<256x64xi32>
    %19 = arith.cmpi eq, %4, %18 : vector<256x64xi32>
    %c0_i32_2 = arith.constant 0 : i32
    %20 = vector.broadcast %c0_i32_2 : i32 to vector<256x64xi32>
    %21 = arith.addi %16, %20 : vector<256x64xi32>
    %22 = arith.cmpi eq, %7, %21 : vector<256x64xi32>
    %23 = arith.andi %19, %22 : vector<256x64xi1>
    %24 = arith.extui %23 : vector<256x64xi1> to vector<256x64xi32>
    %25 = arith.sitofp %24 : vector<256x64xi32> to vector<256x64xf32>
    %cst = arith.constant dense<0.000000e+00> : vector<8x64xf32>
    %26 = tpu.matmul %0, %25, %cst {dimension_numbers = #tpu.dot_dimension_numbers<[1], [0], [0], [1], [0, 0, 1, 1], [], []>} : vector<8x256xf32>, vector<256x64xf32>, vector<8x64xf32> -> vector<8x64xf32>
    %c1_i32 = arith.constant 1 : i32
    %27 = vector.broadcast %c1_i32 : i32 to vector<256x64xi32>
    %28 = arith.addi %16, %27 : vector<256x64xi32>
    %29 = arith.cmpi eq, %7, %28 : vector<256x64xi32>
    %30 = arith.andi %19, %29 : vector<256x64xi1>
    %31 = arith.extui %30 : vector<256x64xi1> to vector<256x64xi32>
    %32 = arith.sitofp %31 : vector<256x64xi32> to vector<256x64xf32>
    %cst_3 = arith.constant dense<0.000000e+00> : vector<8x64xf32>
    %33 = tpu.matmul %0, %32, %cst_3 {dimension_numbers = #tpu.dot_dimension_numbers<[1], [0], [0], [1], [0, 0, 1, 1], [], []>} : vector<8x256xf32>, vector<256x64xf32>, vector<8x64xf32> -> vector<8x64xf32>
    %34 = arith.maximumf %26, %33 : vector<8x64xf32>
    %c1_i32_4 = arith.constant 1 : i32
    %35 = vector.broadcast %c1_i32_4 : i32 to vector<256x64xi32>
    %36 = arith.addi %14, %35 : vector<256x64xi32>
    %37 = arith.cmpi eq, %4, %36 : vector<256x64xi32>
    %c0_i32_5 = arith.constant 0 : i32
    %38 = vector.broadcast %c0_i32_5 : i32 to vector<256x64xi32>
    %39 = arith.addi %16, %38 : vector<256x64xi32>
    %40 = arith.cmpi eq, %7, %39 : vector<256x64xi32>
    %41 = arith.andi %37, %40 : vector<256x64xi1>
    %42 = arith.extui %41 : vector<256x64xi1> to vector<256x64xi32>
    %43 = arith.sitofp %42 : vector<256x64xi32> to vector<256x64xf32>
    %cst_6 = arith.constant dense<0.000000e+00> : vector<8x64xf32>
    %44 = tpu.matmul %0, %43, %cst_6 {dimension_numbers = #tpu.dot_dimension_numbers<[1], [0], [0], [1], [0, 0, 1, 1], [], []>} : vector<8x256xf32>, vector<256x64xf32>, vector<8x64xf32> -> vector<8x64xf32>
    %45 = arith.maximumf %34, %44 : vector<8x64xf32>
    %c1_i32_7 = arith.constant 1 : i32
    %46 = vector.broadcast %c1_i32_7 : i32 to vector<256x64xi32>
    %47 = arith.addi %16, %46 : vector<256x64xi32>
    %48 = arith.cmpi eq, %7, %47 : vector<256x64xi32>
    %49 = arith.andi %37, %48 : vector<256x64xi1>
    %50 = arith.extui %49 : vector<256x64xi1> to vector<256x64xi32>
    %51 = arith.sitofp %50 : vector<256x64xi32> to vector<256x64xf32>
    %cst_8 = arith.constant dense<0.000000e+00> : vector<8x64xf32>
    %52 = tpu.matmul %0, %51, %cst_8 {dimension_numbers = #tpu.dot_dimension_numbers<[1], [0], [0], [1], [0, 0, 1, 1], [], []>} : vector<8x256xf32>, vector<256x64xf32>, vector<8x64xf32> -> vector<8x64xf32>
    %53 = arith.maximumf %45, %52 : vector<8x64xf32>
    %c0_9 = arith.constant 0 : index
    %c0_10 = arith.constant 0 : index
    %54 = vector.load %arg2[%c0_9, %c0_10] : memref<8x64xf32, #tpu.memory_space<vmem>>, vector<8x64xf32>
    tpu.vector_store %arg2[%c0_9, %c0_10], %53 {strides = array<i32>} : memref<8x64xf32, #tpu.memory_space<vmem>>, vector<8x64xf32>,
    return
  }
  func.func @transform_0(%arg0: i32) -> (i32, i32) {
    %c0_i32 = arith.constant 0 : i32
    %c0_i32_0 = arith.constant 0 : i32
    return %arg0, %c0_i32 : i32, i32
  }
  func.func @transform_1(%arg0: i32) -> (i32, i32) {
    %c0_i32 = arith.constant 0 : i32
    %c0_i32_0 = arith.constant 0 : i32
    return %arg0, %c0_i32 : i32, i32
  }
}

</mosaic_0001>

<bundles_post_ra>
// kernel: tpu_custom_call.1
= control target key start
LH: loop header
LB: loop body
LE: loop exit
PB: predicated region body
PF: predicated region fallthrough
CT: control target
= control target key end

     0   :  { %6 = vsyncpa [#allocation3], 0  ;;  %s3178_s0 = inlined_call_operand.hbm [shape: f32[8,256], index: 0, kind: input, shape index: {}]   ;;  %s3179_s1 = inlined_call_operand.hbm [shape: f32[8,64], index: 1, kind: output, shape index: {}]  }
   0x1   :  { %7 = vsyncpa [#allocation4], 0  ;;  %s1548_s6 = smov [#allocation2]   ;;  %s1500_s10 = scalar_lea.hbm %s3178_s0, 256 }
   0x2   :  { %s14_s7 = sshll.u32 %s1548_s6, 4  ;;  %p1501_p0 = scmp.ne.s32.totalorder %s3178_s0, %s1500_s10  ;;  %s15_s7 = int_to_ptr.vmem [resolvable:$true] %s14_s7 }
   0x3   :  { %p1504_p1 = scmp.lt.u32.totalorder %s1500_s10, %s3178_s0 }
   0x5   :  { %p1506_p2 = pnand %p1504_p1, %p1501_p0 }
   0x7   :  { %1509 = shalt.err (!%p1506_p2)
}
   0x8   :  { %s1510_s15 = scalar_lea.vmem %s15_s7, 256  ;;  %p1515_p4 = scmp.lt.s32.totalorder %s15_s7, %s15_s7 }
   0x9   :  { %p1511_p3 = scmp.ne.s32.totalorder %s15_s7, %s1510_s15  ;;  %p1516_p5 = scmp.lt.s32.totalorder %s1510_s15, %s1510_s15 }
   0xb   :  { %p1517_p6 = por %p1516_p5, %p1515_p4 }
   0xd   :  { %p1518_p7 = pnand %p1517_p6, %p1511_p3 }
   0xf   :  { %1521 = shalt.err (!%p1518_p7)
}
  0x10   :  { %17 = dma.hbm_to_vmem [thread:$0]  %s3178_s0, 256, %s15_s7, [#allocation3]   ;;  %v23_v0 = vlaneseq }
  0x11   :  { %1544 = dma.done.wait [#allocation3], 256  }
  0x12   :  { %1545 = vsyncadd [#allocation3], 4294967040  ;;  %v1573_v1 = vshrl.u32 %v23_v0, 7  ;;  %v57_v2 = vand.u32 127, %v23_v0  ;;  %v1623_v26 = vld [vmem:[#allocation2 + $0x8] sm:$0xff]  ;;  %v3222_v51 = vmov 0 }
  0x13   :  { %383 = vmatprep.mubr.f32.mxu0 %v1623_v26  ;;  %582 = vmatprep.mubr.f32.mxu1 %v1623_v26  ;;  %v3188_v30 = vmov 1.0|1.0   ;;  %v3227_v56 = vmov 0  ;;  %v3251_v59 = vmov 0  ;;  %s1550_s0 = smov [#allocation5]  }
  0x14   :  { %v40_v3 = vadd.s32 128, %v1573_v1  ;;  %v41_v4 = vadd.s32 136, %v1573_v1  ;;  %v154_v5 = vshra.s32 %v57_v2, 3  ;;  %v25_v6 = vadd.s32 8, %v1573_v1  ;;  %s964_s18 = sshll.u32 %s1550_s0, 4  ;;  %s965_s18 = int_to_ptr.vmem [resolvable:$true] %s964_s18 }
  0x15   :  { %v1579_v7 = vshra.s32 %v1573_v1, 4  ;;  %v42_v19 = vadd.s32 144, %v1573_v1  ;;  %v43_v20 = vadd.s32 152, %v1573_v1  ;;  %v26_v27 = vadd.s32 16, %v1573_v1  ;;  %s1522_s19 = scalar_lea.vmem %s965_s18, 128  ;;  %p1527_p9 = scmp.lt.s32.totalorder %s965_s18, %s965_s18 }
  0x16   :  { %v1581_v8 = vshra.s32 %v40_v3, 4  ;;  %v1583_v9 = vshra.s32 %v41_v4, 4  ;;  %v155_v10 = vmul.u32 8, %v154_v5  ;;  %v1585_v11 = vmul.u32 2, %v154_v5  ;;  %p1523_p8 = scmp.ne.s32.totalorder %s965_s18, %s1522_s19  ;;  %p1528_p10 = scmp.lt.s32.totalorder %s1522_s19, %s1522_s19 }
  0x17   :  { %v1587_v12 = vshra.s32 %v25_v6, 4  ;;  %v90_v13 = vmul.u32 16, %v1579_v7  ;;  %v27_v28 = vadd.s32 24, %v1573_v1  ;;  %v1647_v29 = vshra.s32 %v42_v19, 4 }
  0x18   :  { %v106_v14 = vmul.u32 16, %v1581_v8  ;;  %v107_v15 = vmul.u32 16, %v1583_v9  ;;  %v156_v16 = vsub.s32 %v57_v2, %v155_v10  ;;  %v1593_v17 = vadd.s32 1, %v1585_v11  ;;  %p1529_p11 = por %p1528_p10, %p1527_p9 }
  0x19   :  { %v91_v18 = vmul.u32 16, %v1587_v12  ;;  %vm175_vm0 = vcmp.eq.s32.totalorder %v1581_v8, %v1585_v11  ;;  %vm176_vm1 = vcmp.eq.s32.totalorder %v1583_v9, %v1585_v11  ;;  %v1613_v24 = vsub.s32 %v1573_v1, %v90_v13 }
  0x1a   :  { %v1598_v21 = vsub.s32 %v40_v3, %v106_v14  ;;  %v1600_v22 = vsub.s32 %v41_v4, %v107_v15  ;;  %v1602_v23 = vmul.u32 2, %v156_v16  ;;  %vm606_vm2 = vcmp.eq.s32.totalorder %v1581_v8, %v1593_v17  ;;  %p1530_p12 = pnand %p1529_p11, %p1523_p8 }
  0x1b   :  { %vm3181_vm3 = vcmp.eq.s32.totalorder %v1583_v9, %v1593_v17  ;;  %v1619_v25 = vsub.s32 %v25_v6, %v91_v18  ;;  %vm3183_vm6 = vcmp.eq.s32.totalorder %v1579_v7, %v1593_v17  ;;  %vm3182_vm8 = vcmp.eq.s32.totalorder %v1587_v12, %v1593_v17 }
  0x1c   :  { %vm207_vm4 = vcmp.eq.s32.totalorder %v1598_v21, %v1602_v23  ;;  %vm208_vm5 = vcmp.eq.s32.totalorder %v1600_v22, %v1602_v23  ;;  %vm3180_vm11 = vcmp.eq.s32.totalorder %v1579_v7, %v1585_v11  ;;  %vm191_vm12 = vcmp.eq.s32.totalorder %v1613_v24, %v1602_v23 }
  0x1d   :  { %vm239_vm7 = vmand %vm175_vm0, %vm207_vm4  ;;  %vm160_vm14 = vcmp.eq.s32.totalorder %v1587_v12, %v1585_v11  ;;  %vm192_vm15 = vcmp.eq.s32.totalorder %v1619_v25, %v1602_v23  ;;  %v1665_v32 = vadd.s32 1, %v1602_v23  ;;  %v1667_v33 = vshra.s32 %v43_v20, 4 }
  0x1e   :  { %vm240_vm9 = vmand %vm176_vm1, %vm208_vm5  ;;  %v1679_v35 = vshra.s32 %v26_v27, 4  ;;  %v1681_v36 = vshra.s32 %v27_v28, 4  ;;  %v1700_v37 = vadd.s32 32, %v1573_v1  ;;  %v1703_v38 = vadd.s32 40, %v1573_v1 }
  0x1f   :  { %vm1369_vm10 = vmpackc.low %vm240_vm9, %vm239_vm7  ;;  %3213 = vst [vmem:[#allocation8_spill] sm:$0xff] %v1667_v33  ;;  %v108_v39 = vmul.u32 16, %v1647_v29  ;;  %v109_v40 = vmul.u32 16, %v1667_v33  ;;  %v44_v43 = vadd.s32 160, %v1573_v1  ;;  %v45_v44 = vadd.s32 168, %v1573_v1 }
  0x20   :  { %1370 = vmatprep.subr.msk.bf16.mxu0 %vm1369_vm10, %v3188_v30  ;;  %vm1656_vm13 = vmand %vm606_vm2, %vm207_vm4  ;;  %v92_v45 = vmul.u32 16, %v1679_v35  ;;  %v93_v46 = vmul.u32 16, %v1681_v36  ;;  %v1743_v47 = vshra.s32 %v1700_v37, 4  ;;  %v1746_v48 = vshra.s32 %v1703_v38, 4 }
  0x21   :  { %vm1675_vm4 = vmand %vm3181_vm3, %vm208_vm5  ;;  %vm406_vm3 = vcmp.eq.s32.totalorder %v1598_v21, %v1665_v32  ;;  %v1754_v49 = vsub.s32 %v42_v19, %v108_v39  ;;  %v1756_v50 = vsub.s32 %v43_v20, %v109_v40  ;;  %vm391_vm9 = vcmp.eq.s32.totalorder %v1619_v25, %v1665_v32 }
  0x22   :  { %vm223_vm7 = vmand %vm3180_vm11, %vm191_vm12  ;;  %v1777_v52 = vshra.s32 %v44_v43, 4  ;;  %v1779_v53 = vshra.s32 %v45_v44, 4  ;;  %v1782_v54 = vadd.s32 176, %v1573_v1  ;;  %v1785_v55 = vadd.s32 184, %v1573_v1 }
  0x23   :  { %vm224_vm5 = vmand %vm160_vm14, %vm192_vm15  ;;  %3220 = vst [vmem:[#allocation9_spill] sm:$0xff] %v1754_v49  ;;  %v1801_v57 = vsub.s32 %v26_v27, %v92_v45  ;;  %v1803_v58 = vsub.s32 %v27_v28, %v93_v46  ;;  %v30_v62 = vadd.s32 48, %v1573_v1  ;;  %v31_v63 = vadd.s32 56, %v1573_v1 }
  0x24   :  { %vm1371_vm11 = vmpackc.low %vm224_vm5, %vm223_vm7  ;;  %vm407_vm7 = vcmp.eq.s32.totalorder %v1600_v22, %v1665_v32  ;;  %3221 = vst [vmem:[#allocation10_spill] sm:$0xff] %v1756_v50  ;;  %vm390_vm5 = vcmp.eq.s32.totalorder %v1613_v24, %v1665_v32  ;;  %v1830_v60 = vshra.s32 %v1782_v54, 4  ;;  %v1833_v61 = vshra.s32 %v1785_v55, 4 }
  0x25   :  { %1372 = vmatpush3.bf16.msk.msra.mxu0 %vm1371_vm11, %v3188_v30  ;;  %vm1716_vm10 = vmand %vm3183_vm6, %vm191_vm12  ;;  %3224 = vst [vmem:[#allocation11_spill] sm:$0xff] %v1777_v52  ;;  %v110_v0 = vmul.u32 16, %v1777_v52  ;;  %v111_v2 = vmul.u32 16, %v1779_v53  ;;  %v48_v3 = vadd.s32 192, %v1573_v1  ;;  %v49_v4 = vadd.s32 200, %v1573_v1 }
  0x26   :  { %vm1728_vm11 = vmand %vm3182_vm8, %vm192_vm15  ;;  %3225 = vst [vmem:[#allocation12_spill] sm:$0xff] %v1779_v53  ;;  %v3233_v5 = vmov 0  ;;  %v32_v6 = vadd.s32 64, %v1573_v1  ;;  %v33_v8 = vadd.s32 72, %v1573_v1  ;;  %v95_v10 = vmul.u32 16, %v1746_v48 }
  0x27   :  { %vm438_vm12 = vmand %vm175_vm0, %vm406_vm3  ;;  %v1876_v13 = vshra.s32 %v30_v62, 4  ;;  %v1878_v14 = vshra.s32 %v31_v63, 4  ;;  %v112_v15 = vmul.u32 16, %v1830_v60  ;;  %v113_v16 = vmul.u32 16, %v1833_v61 }
  0x28   :  { %vm439_vm15 = vmand %vm176_vm1, %vm407_vm7  ;;  %v1892_v18 = vshra.s32 %v48_v3, 4  ;;  %v1894_v19 = vshra.s32 %v49_v4, 4  ;;  %v1902_v20 = vsub.s32 %v44_v43, %v110_v0  ;;  %v1904_v21 = vsub.s32 %v45_v44, %v111_v2 }
  0x29   :  { %vm1401_vm0 = vmpackc.low %vm439_vm15, %vm438_vm12  ;;  %vm3226_vm12 = vcmp.eq.s32.totalorder %v1583_v9, %v1593_v17  ;;  %v94_v9 = vmul.u32 16, %v1743_v47  ;;  %v96_v22 = vmul.u32 16, %v1876_v13  ;;  %v1914_v25 = vshra.s32 %v32_v6, 4 }
  0x2a   :  { %1402 = vmatprep.subr.msk.bf16.mxu1 %vm1401_vm0, %v3188_v30  ;;  %vm1773_vm1 = vmand %vm606_vm2, %vm406_vm3  ;;  %vm3185_vm3 = vcmp.eq.s32.totalorder %v1647_v29, %v1585_v11  ;;  %vm3229_vm0 = vcmp.eq.s32.totalorder %v1579_v7, %v1585_v11  ;;  %3242 = vst [vmem:[#allocation13_spill] sm:$0xff] %v1902_v20  ;;  %v97_v24 = vmul.u32 16, %v1878_v14  ;;  %v1916_v27 = vshra.s32 %v33_v8, 4  ;;  %v3484_v31 = vld [vmem:[#allocation9_spill] sm:$0xff] }
  0x2b   :  { %v3223_v51 = vsel %vm1773_vm1, 4294967295, %v3222_v51  ;;  %vm1793_vm2 = vmand %vm3226_vm12, %vm407_vm7  ;;  %vm3184_vm12 = vcmp.eq.s32.totalorder %v1754_v49, %v1602_v23  ;;  %3243 = vst [vmem:[#allocation14_spill] sm:$0xff] %v1904_v21  ;;  %v1934_v39 = vsub.s32 %v1700_v37, %v94_v9  ;;  %v1937_v40 = vsub.s32 %v1703_v38, %v95_v10  ;;  %v3487_v34 = vld [vmem:[#allocation10_spill] sm:$0xff] }
  0x2c   :  { %v3228_v56 = vsel %vm1793_vm2, 4294967295, %v3227_v56  ;;  %vm1811_vm7 = vmand %vm3229_vm0, %vm390_vm5  ;;  %v114_v43 = vmul.u32 16, %v1892_v18  ;;  %v115_v44 = vmul.u32 16, %v1894_v19  ;;  %v1958_v37 = vsub.s32 %v1782_v54, %v112_v15 }
  0x2d   :  { %vm423_vm0 = vmand %vm160_vm14, %vm391_vm9  ;;  %vm3232_vm14 = vcmp.eq.s32.totalorder %v1579_v7, %v1593_v17  ;;  %v3236_v7 = vmov 0  ;;  %v1961_v38 = vsub.s32 %v1785_v55, %v113_v16  ;;  %v1963_v45 = vsub.s32 %v30_v62, %v96_v22 }
  0x2e   :  { %vm1403_vm15 = vmpackc.low %vm423_vm0, %vm1811_vm7  ;;  %vm3186_vm0 = vcmp.eq.s32.totalorder %v1801_v57, %v1602_v23  ;;  %v1965_v46 = vsub.s32 %v31_v63, %v97_v24  ;;  %v1982_v54 = vsub.s32 %v48_v3, %v114_v43  ;;  %v1984_v55 = vsub.s32 %v49_v4, %v115_v44 }
  0x2f   :  { %1404 = vmatpush3.bf16.msk.msra.mxu1 %vm1403_vm15, %v3188_v30  ;;  %vm1852_vm7 = vmand %vm3232_vm14, %vm390_vm5  ;;  %vm3235_vm5 = vcmp.eq.s32.totalorder %v1587_v12, %v1593_v17  ;;  %v98_v62 = vmul.u32 16, %v1914_v25  ;;  %v99_v63 = vmul.u32 16, %v1916_v27  ;;  %v3256_v0 = vmov 0 }
  0x30   :  { %v3234_v5 = vsel %vm1852_vm7, 4294967295, %v3233_v5  ;;  %vm1870_vm15 = vmand %vm3235_vm5, %vm391_vm9  ;;  %vm3240_vm9 = vcmp.eq.s32.totalorder %v1756_v50, %v1602_v23  ;;  %vm3241_vm5 = vcmp.eq.s32.totalorder %v1667_v33, %v1585_v11  ;;  %v34_v15 = vadd.s32 80, %v1573_v1 }
  0x31   :  { %v3237_v7 = vsel %vm1870_vm15, 4294967295, %v3236_v7  ;;  %vm1886_vm14 = vmand %vm3185_vm3, %vm3184_vm12  ;;  %vm3259_vm15 = vcmp.eq.s32.totalorder %v1754_v49, %v1665_v32  ;;  %v2024_v3 = vsub.s32 %v32_v6, %v98_v62  ;;  %v2026_v4 = vsub.s32 %v33_v8, %v99_v63 }
  0x32   :  { %vm242_vm6 = vmand %vm3241_vm5, %vm3240_vm9  ;;  %vm3244_vm9 = vcmp.eq.s32.totalorder %v1679_v35, %v1585_v11  ;;  %v50_v6 = vadd.s32 208, %v1573_v1  ;;  %v51_v8 = vadd.s32 216, %v1573_v1  ;;  %v35_v16 = vadd.s32 88, %v1573_v1 }
  0x33   :  { %vm1373_vm12 = vmpackc.low %vm242_vm6, %vm1886_vm14  ;;  %v52_v22 = vadd.s32 224, %v1573_v1  ;;  %v53_v24 = vadd.s32 232, %v1573_v1  ;;  %v2080_v28 = vadd.s32 96, %v1573_v1  ;;  %v2083_v43 = vadd.s32 104, %v1573_v1 }
  0x34   :  { %1374 = vmatprep.subr.msk.bf16.mxu0 %vm1373_vm12, %v3188_v30  ;;  %vm1925_vm5 = vmand %vm3244_vm9, %vm3186_vm0  ;;  %vm3247_vm12 = vcmp.eq.s32.totalorder %v1803_v58, %v1602_v23  ;;  %vm3248_vm9 = vcmp.eq.s32.totalorder %v1681_v36, %v1585_v11  ;;  %v2065_v10 = vshra.s32 %v50_v6, 4  ;;  %v2067_v12 = vshra.s32 %v51_v8, 4 }
  0x35   :  { %vm226_vm8 = vmand %vm3248_vm9, %vm3247_vm12  ;;  %v3273_v63 = vmov 0  ;;  %v2108_v2 = vshra.s32 %v34_v15, 4  ;;  %v2110_v9 = vshra.s32 %v35_v16, 4  ;;  %vm3285_vm14 = vcmp.eq.s32.totalorder %v1904_v21, %v1602_v23 }
  0x36   :  { %vm1375_vm6 = vmpackc.low %vm226_vm8, %vm1925_vm5  ;;  %vm3249_vm8 = vcmp.eq.s32.totalorder %v1801_v57, %v1602_v23  ;;  %vm3250_vm5 = vcmp.eq.s32.totalorder %v1679_v35, %v1593_v17  ;;  %v116_v44 = vmul.u32 16, %v2065_v10  ;;  %v117_v62 = vmul.u32 16, %v2067_v12 }
  0x37   :  { %1376 = vmatpush3.bf16.msk.msra.mxu0 %vm1375_vm6, %v3188_v30  ;;  %vm1974_vm12 = vmand %vm3250_vm5, %vm3249_vm8  ;;  %vm3254_vm6 = vcmp.eq.s32.totalorder %v1803_v58, %v1602_v23  ;;  %vm3255_vm8 = vcmp.eq.s32.totalorder %v1681_v36, %v1593_v17 }
  0x38   :  { %v3252_v59 = vsel %vm1974_vm12, 4294967295, %v3251_v59  ;;  %vm1994_vm5 = vmand %vm3255_vm8, %vm3254_vm6  ;;  %vm3260_vm6 = vcmp.eq.s32.totalorder %v1647_v29, %v1585_v11 }
  0x39   :  { %3253 = vst [vmem:[#allocation15_spill] sm:$0xff] %v3252_v59  ;;  %v3257_v0 = vsel %vm1994_vm5, 4294967295, %v3256_v0  ;;  %vm2012_vm8 = vmand %vm3260_vm6, %vm3259_vm15  ;;  %vm3263_vm15 = vcmp.eq.s32.totalorder %v1756_v50, %v1665_v32  ;;  %vm3264_vm6 = vcmp.eq.s32.totalorder %v1667_v33, %v1585_v11  ;;  %vm3265_vm5 = vcmp.eq.s32.totalorder %v1801_v57, %v1665_v32 }
  0x3a   :  { %3258 = vst [vmem:[#allocation16_spill] sm:$0xff] %v3257_v0  ;;  %vm441_vm3 = vmand %vm3264_vm6, %vm3263_vm15  ;;  %vm3271_vm6 = vcmp.eq.s32.totalorder %v1801_v57, %v1665_v32  ;;  %v2112_v0 = vshra.s32 %v52_v22, 4  ;;  %v2126_v57 = vsub.s32 %v50_v6, %v116_v44  ;;  %v2131_v59 = vshra.s32 %v2080_v28, 4 }
  0x3b   :  { %vm1405_vm12 = vmpackc.low %vm441_vm3, %vm2012_vm8  ;;  %vm3266_vm3 = vcmp.eq.s32.totalorder %v1679_v35, %v1585_v11  ;;  %v2134_v50 = vshra.s32 %v2083_v43, 4  ;;  %v101_v6 = vmul.u32 16, %v2110_v9  ;;  %vm3288_vm15 = vcmp.eq.s32.totalorder %v1934_v39, %v1602_v23 }
  0x3c   :  { %1406 = vmatprep.subr.msk.bf16.mxu1 %vm1405_vm12, %v3188_v30  ;;  %vm2061_vm8 = vmand %vm3266_vm3, %vm3265_vm5  ;;  %vm3269_vm12 = vcmp.eq.s32.totalorder %v1803_v58, %v1665_v32  ;;  %v100_v58 = vmul.u32 16, %v2108_v2  ;;  %vm3289_vm3 = vcmp.eq.s32.totalorder %v1743_v47, %v1585_v11 }
  0x3d   :  { %vm3270_vm0 = vmmov %vm3248_vm9  ;;  %v2174_v44 = vsub.s32 %v35_v16, %v101_v6  ;;  %v103_v49 = vmul.u32 16, %v2134_v50 }
  0x3e   :  { %vm425_vm9 = vmand %vm3270_vm0, %vm3269_vm12  ;;  %vm3282_vm0 = vcmp.eq.s32.totalorder %v1777_v52, %v1585_v11 }
  0x3f   :  { %vm1407_vm5 = vmpackc.low %vm425_vm9, %vm2061_vm8  ;;  %vm3272_vm9 = vcmp.eq.s32.totalorder %v1679_v35, %v1593_v17  ;;  %v3278_v35 = vmov 0 }
  0x40   :  { %1408 = vmatpush3.bf16.msk.msra.mxu1 %vm1407_vm5, %v3188_v30  ;;  %vm2102_vm8 = vmand %vm3272_vm9, %vm3271_vm6  ;;  %v2114_v30 = vshra.s32 %v53_v24, 4  ;;  %vm3277_vm6 = vcmp.eq.s32.totalorder %v1681_v36, %v1593_v17  ;;  %v3296_v36 = vmov 0  ;;  %v3491_v41 = vld [vmem:[#allocation15_spill] sm:$0xff] }
  0x41   :  { %v3274_v63 = vsel %vm2102_vm8, 4294967295, %v3273_v63  ;;  %vm3276_vm5 = vmmov %vm3269_vm12  ;;  %vm3281_vm12 = vcmp.eq.s32.totalorder %v1902_v20, %v1602_v23  ;;  %v3493_v42 = vld [vmem:[#allocation16_spill] sm:$0xff] }
  0x42   :  { %3275 = vst [vmem:[#allocation17_spill] sm:$0xff] %v3274_v63  ;;  %vm2122_vm9 = vmand %vm3277_vm6, %vm3276_vm5  ;;  %v2128_v63 = vsub.s32 %v51_v8, %v117_v62  ;;  %v2172_v8 = vsub.s32 %v34_v15, %v100_v58  ;;  %v3287_v62 = vmov 1.0|1.0   ;;  %v118_v15 = vmul.u32 16, %v2112_v0 }
  0x43   :  { %v3279_v35 = vsel %vm2122_vm9, 4294967295, %v3278_v35  ;;  %vm2142_vm5 = vmand %vm3282_vm0, %vm3281_vm12  ;;  %vm3286_vm0 = vcmp.eq.s32.totalorder %v1779_v53, %v1585_v11  ;;  %v119_v16 = vmul.u32 16, %v2114_v30  ;;  %vm3314_vm9 = vcmp.eq.s32.totalorder %v1937_v40, %v1665_v32 }
  0x44   :  { %3280 = vst [vmem:[#allocation18_spill] sm:$0xff] %v3279_v35  ;;  %vm244_vm12 = vmand %vm3286_vm0, %vm3285_vm14  ;;  %vm3293_vm0 = vcmp.eq.s32.totalorder %v1746_v48, %v1585_v11  ;;  %v2217_v58 = vsub.s32 %v52_v22, %v118_v15  ;;  %v102_v35 = vmul.u32 16, %v2131_v59  ;;  %v3301_v22 = vmov 0 }
  0x45   :  { %vm1377_vm7 = vmpackc.low %vm244_vm12, %vm2142_vm5  ;;  %vm3292_vm12 = vcmp.eq.s32.totalorder %v1937_v40, %v1602_v23  ;;  %v2219_v6 = vsub.s32 %v53_v24, %v119_v16  ;;  %vm3300_vm5 = vcmp.eq.s32.totalorder %v1746_v48, %v1593_v17  ;;  %v2264_v15 = vsub.s32 %v2083_v43, %v103_v49 }
  0x46   :  { %1378 = vmatprep.subr.msk.bf16.mxu0 %vm1377_vm7, %v3287_v62  ;;  %vm2187_vm8 = vmand %vm3289_vm3, %vm3288_vm15  ;;  %v2261_v24 = vsub.s32 %v2080_v28, %v102_v35  ;;  %v54_v49 = vadd.s32 240, %v1573_v1  ;;  %v55_v28 = vadd.s32 248, %v1573_v1  ;;  %vm3328_vm14 = vcmp.eq.s32.totalorder %v1961_v38, %v1602_v23 }
  0x47   :  { %vm228_vm15 = vmand %vm3293_vm0, %vm3292_vm12  ;;  %vm3294_vm12 = vcmp.eq.s32.totalorder %v1934_v39, %v1602_v23 }
  0x48   :  { %vm1379_vm7 = vmpackc.low %vm228_vm15, %vm2187_vm8  ;;  %vm3295_vm8 = vcmp.eq.s32.totalorder %v1743_v47, %v1593_v17  ;;  %v2306_v43 = vshra.s32 %v54_v49, 4  ;;  %v2308_v35 = vshra.s32 %v55_v28, 4 }
  0x49   :  { %1380 = vmatpush3.bf16.msk.msra.mxu0 %vm1379_vm7, %v3287_v62  ;;  %vm2230_vm15 = vmand %vm3295_vm8, %vm3294_vm12  ;;  %vm3299_vm8 = vcmp.eq.s32.totalorder %v1937_v40, %v1602_v23  ;;  %vm3304_vm12 = vcmp.eq.s32.totalorder %v1902_v20, %v1665_v32  ;;  %vm3333_vm7 = vcmp.eq.s32.totalorder %v1878_v14, %v1585_v11 }
  0x4a   :  { %v3297_v36 = vsel %vm2230_vm15, 4294967295, %v3296_v36  ;;  %vm2252_vm6 = vmand %vm3300_vm5, %vm3299_vm8  ;;  %vm3305_vm5 = vcmp.eq.s32.totalorder %v1777_v52, %v1585_v11  ;;  %v121_v16 = vmul.u32 16, %v2308_v35 }
  0x4b   :  { %3298 = vst [vmem:[#allocation19_spill] sm:$0xff] %v3297_v36  ;;  %v3302_v22 = vsel %vm2252_vm6, 4294967295, %v3301_v22  ;;  %vm2272_vm8 = vmand %vm3305_vm5, %vm3304_vm12  ;;  %vm3308_vm12 = vcmp.eq.s32.totalorder %v1904_v21, %v1665_v32  ;;  %vm3309_vm5 = vcmp.eq.s32.totalorder %v1779_v53, %v1585_v11  ;;  %v39_v36 = vadd.s32 120, %v1573_v1 }
  0x4c   :  { %3303 = vst [vmem:[#allocation20_spill] sm:$0xff] %v3302_v22  ;;  %vm443_vm3 = vmand %vm3309_vm5, %vm3308_vm12  ;;  %v38_v22 = vadd.s32 112, %v1573_v1  ;;  %vm3310_vm5 = vcmp.eq.s32.totalorder %v1934_v39, %v1665_v32  ;;  %vm3311_vm6 = vcmp.eq.s32.totalorder %v1743_v47, %v1585_v11  ;;  %v120_v1 = vmul.u32 16, %v2306_v43 }
  0x4d   :  { %vm1409_vm12 = vmpackc.low %vm443_vm3, %vm2272_vm8  ;;  %v2347_v52 = vshra.s32 %v39_v36, 4  ;;  %vm3316_vm3 = vcmp.eq.s32.totalorder %v1934_v39, %v1665_v32  ;;  %v3318_v21 = vmov 0  ;;  %v2366_v33 = vsub.s32 %v55_v28, %v121_v16 }
  0x4e   :  { %1410 = vmatprep.subr.msk.bf16.mxu1 %vm1409_vm12, %v3287_v62  ;;  %vm2319_vm15 = vmand %vm3311_vm6, %vm3310_vm5  ;;  %v2345_v53 = vshra.s32 %v38_v22, 4  ;;  %v2364_v20 = vsub.s32 %v54_v49, %v120_v1  ;;  %v3378_v1 = vmov 0  ;;  %v3382_v16 = vmov 0 }
  0x4f   :  { %vm3315_vm6 = vmmov %vm3293_vm0  ;;  %vm3317_vm0 = vcmp.eq.s32.totalorder %v1743_v47, %v1593_v17  ;;  %v3322_v47 = vmov 0  ;;  %v105_v49 = vmul.u32 16, %v2347_v52 }
  0x50   :  { %vm427_vm5 = vmand %vm3315_vm6, %vm3314_vm9  ;;  %vm3321_vm6 = vcmp.eq.s32.totalorder %v1746_v48, %v1593_v17  ;;  %v104_v39 = vmul.u32 16, %v2345_v53 }
  0x51   :  { %vm1411_vm12 = vmpackc.low %vm427_vm5, %vm2319_vm15  ;;  %vm3324_vm15 = vcmp.eq.s32.totalorder %v1958_v37, %v1602_v23  ;;  %v2414_v28 = vsub.s32 %v39_v36, %v105_v49  ;;  %v3336_v36 = vmov 0 }
  0x52   :  { %1412 = vmatpush3.bf16.msk.msra.mxu1 %vm1411_vm12, %v3287_v62  ;;  %vm2360_vm8 = vmand %vm3317_vm0, %vm3316_vm3  ;;  %v2412_v40 = vsub.s32 %v38_v22, %v104_v39  ;;  %vm3330_vm3 = vcmp.eq.s32.totalorder %v1963_v45, %v1602_v23  ;;  %v3340_v22 = vmov 0 }
  0x53   :  { %v3319_v21 = vsel %vm2360_vm8, 4294967295, %v3318_v21  ;;  %vm3320_vm5 = vmmov %vm3314_vm9  ;;  %vm3325_vm9 = vcmp.eq.s32.totalorder %v1830_v60, %v1585_v11  ;;  %v3513_v39 = vld [vmem:[#allocation20_spill] sm:$0xff] }
  0x54   :  { %vm2378_vm0 = vmand %vm3321_vm6, %vm3320_vm5  ;;  %vm3335_vm5 = vcmp.eq.s32.totalorder %v1876_v13, %v1593_v17 }
  0x55   :  { %v3323_v47 = vsel %vm2378_vm0, 4294967295, %v3322_v47  ;;  %vm2394_vm6 = vmand %vm3325_vm9, %vm3324_vm15  ;;  %vm3329_vm9 = vcmp.eq.s32.totalorder %v1833_v61, %v1585_v11 }
  0x56   :  { %vm246_vm15 = vmand %vm3329_vm9, %vm3328_vm14  ;;  %vm3209_vm14 = vcmp.eq.s32.totalorder %v1958_v37, %v1665_v32 }
  0x57   :  { %vm1381_vm12 = vmpackc.low %vm246_vm15, %vm2394_vm6  ;;  %vm3331_vm6 = vcmp.eq.s32.totalorder %v1876_v13, %v1585_v11 }
  0x58   :  { %1382 = vmatprep.subr.msk.bf16.mxu0 %vm1381_vm12, %v3287_v62  ;;  %vm229_vm15 = vmand %vm3331_vm6, %vm3330_vm3  ;;  %vm3332_vm12 = vcmp.eq.s32.totalorder %v1965_v46, %v1602_v23  ;;  %vm3343_vm6 = vcmp.eq.s32.totalorder %v1833_v61, %v1585_v11 }
  0x59   :  { %vm230_vm8 = vmand %vm3333_vm7, %vm3332_vm12  ;;  %vm3210_vm7 = vcmp.eq.s32.totalorder %v1961_v38, %v1665_v32 }
  0x5a   :  { %vm1383_vm0 = vmpackc.low %vm230_vm8, %vm229_vm15  ;;  %vm3339_vm15 = vcmp.eq.s32.totalorder %v1878_v14, %v1593_v17 }
  0x5b   :  { %1384 = vmatpush3.bf16.msk.msra.mxu0 %vm1383_vm0, %v3287_v62  ;;  %vm3334_vm9 = vmmov %vm3330_vm3 }
  0x5c   :  { %vm2464_vm2 = vmand %vm3335_vm5, %vm3334_vm9  ;;  %vm3342_vm5 = vcmp.eq.s32.totalorder %v1830_v60, %v1585_v11 }
  0x5d   :  { %v3337_v36 = vsel %vm2464_vm2, 4294967295, %v3336_v36  ;;  %vm3338_vm8 = vmmov %vm3332_vm12  ;;  %vm396_vm12 = vcmp.eq.s32.totalorder %v1963_v45, %v1665_v32  ;;  %v3347_v45 = vmov 0 }
  0x5e   :  { %vm2476_vm0 = vmand %vm3339_vm15, %vm3338_vm8  ;;  %vm397_vm15 = vcmp.eq.s32.totalorder %v1965_v46, %v1665_v32  ;;  %v3350_v46 = vmov 0 }
  0x5f   :  { %v3341_v22 = vsel %vm2476_vm0, 4294967295, %v3340_v22  ;;  %vm444_vm9 = vmand %vm3342_vm5, %vm3209_vm14  ;;  %vm3344_vm0 = vcmp.eq.s32.totalorder %v1876_v13, %v1585_v11  ;;  %vm3345_vm14 = vcmp.eq.s32.totalorder %v1878_v14, %v1585_v11 }
  0x60   :  { %vm445_vm8 = vmand %vm3343_vm6, %vm3210_vm7  ;;  %vm3346_vm6 = vcmp.eq.s32.totalorder %v1876_v13, %v1593_v17  ;;  %v3362_v13 = vmov 0 }
  0x61   :  { %vm1413_vm3 = vmpackc.low %vm445_vm8, %vm444_vm9 }
  0x62   :  { %1414 = vmatprep.subr.msk.bf16.mxu1 %vm1413_vm3, %v3287_v62  ;;  %vm428_vm5 = vmand %vm3344_vm0, %vm396_vm12  ;;  %vm3349_vm3 = vcmp.eq.s32.totalorder %v1878_v14, %v1593_v17  ;;  %vm3354_vm0 = vcmp.eq.s32.totalorder %v1984_v55, %v1602_v23  ;;  %v3366_v14 = vmov 0 }
  0x63   :  { %vm429_vm2 = vmand %vm3345_vm14, %vm397_vm15  ;;  %vm3352_vm14 = vcmp.eq.s32.totalorder %v1982_v54, %v1602_v23 }
  0x64   :  { %vm1415_vm1 = vmpackc.low %vm429_vm2, %vm428_vm5 }
  0x65   :  { %1416 = vmatpush3.bf16.msk.msra.mxu1 %vm1415_vm1, %v3287_v62  ;;  %vm2507_vm7 = vmand %vm3346_vm6, %vm396_vm12  ;;  %vm3353_vm1 = vcmp.eq.s32.totalorder %v1892_v18, %v1585_v11  ;;  %vm3355_vm12 = vcmp.eq.s32.totalorder %v1894_v19, %v1585_v11  ;;  %vm3357_vm6 = vcmp.eq.s32.totalorder %v1914_v25, %v1585_v11 }
  0x66   :  { %v3348_v45 = vsel %vm2507_vm7, 4294967295, %v3347_v45  ;;  %vm2514_vm9 = vmand %vm3349_vm3, %vm397_vm15  ;;  %vm3356_vm15 = vcmp.eq.s32.totalorder %v2024_v3, %v1602_v23 }
  0x67   :  { %v3351_v46 = vsel %vm2514_vm9, 4294967295, %v3350_v46  ;;  %vm247_vm2 = vmand %vm3353_vm1, %vm3352_vm14  ;;  %vm3358_vm14 = vcmp.eq.s32.totalorder %v2026_v4, %v1602_v23  ;;  %vm3359_vm1 = vcmp.eq.s32.totalorder %v1916_v27, %v1585_v11 }
  0x68   :  { %vm248_vm8 = vmand %vm3355_vm12, %vm3354_vm0  ;;  %vm3361_vm0 = vcmp.eq.s32.totalorder %v1914_v25, %v1593_v17 }
  0x69   :  { %vm1385_vm5 = vmpackc.low %vm248_vm8, %vm247_vm2 }
  0x6a   :  { %1386 = vmatprep.subr.msk.bf16.mxu0 %vm1385_vm5, %v3287_v62  ;;  %vm231_vm3 = vmand %vm3357_vm6, %vm3356_vm15  ;;  %vm3365_vm5 = vcmp.eq.s32.totalorder %v1916_v27, %v1593_v17 }
  0x6b   :  { %vm232_vm9 = vmand %vm3359_vm1, %vm3358_vm14 }
  0x6c   :  { %vm1387_vm7 = vmpackc.low %vm232_vm9, %vm231_vm3  ;;  %vm3369_vm9 = vcmp.eq.s32.totalorder %v1892_v18, %v1585_v11  ;;  %vm3370_vm3 = vcmp.eq.s32.totalorder %v1984_v55, %v1665_v32 }
  0x6d   :  { %1388 = vmatpush3.bf16.msk.msra.mxu0 %vm1387_vm7, %v3287_v62  ;;  %vm3360_vm2 = vmmov %vm3356_vm15  ;;  %vm3368_vm7 = vcmp.eq.s32.totalorder %v1982_v54, %v1665_v32 }
  0x6e   :  { %vm2550_vm12 = vmand %vm3361_vm0, %vm3360_vm2  ;;  %vm3372_vm0 = vcmp.eq.s32.totalorder %v2024_v3, %v1665_v32  ;;  %v3410_v3 = vmov 0 }
  0x6f   :  { %v3363_v13 = vsel %vm2550_vm12, 4294967295, %v3362_v13  ;;  %vm3364_vm8 = vmmov %vm3358_vm14  ;;  %vm3371_vm14 = vcmp.eq.s32.totalorder %v1894_v19, %v1585_v11 }
  0x70   :  { %vm2560_vm15 = vmand %vm3365_vm5, %vm3364_vm8  ;;  %vm3373_vm8 = vcmp.eq.s32.totalorder %v1914_v25, %v1585_v11 }
  0x71   :  { %v3367_v14 = vsel %vm2560_vm15, 4294967295, %v3366_v14  ;;  %vm446_vm6 = vmand %vm3369_vm9, %vm3368_vm7  ;;  %vm3374_vm7 = vcmp.eq.s32.totalorder %v2026_v4, %v1665_v32  ;;  %vm3375_vm9 = vcmp.eq.s32.totalorder %v1916_v27, %v1585_v11  ;;  %v3414_v4 = vmov 0 }
  0x72   :  { %vm447_vm1 = vmand %vm3371_vm14, %vm3370_vm3  ;;  %vm3377_vm3 = vcmp.eq.s32.totalorder %v1914_v25, %v1593_v17  ;;  %v3394_v25 = vmov 0 }
  0x73   :  { %vm1417_vm2 = vmpackc.low %vm447_vm1, %vm446_vm6 }
  0x74   :  { %1418 = vmatprep.subr.msk.bf16.mxu1 %vm1417_vm2, %v3287_v62  ;;  %vm430_vm5 = vmand %vm3373_vm8, %vm3372_vm0  ;;  %vm3381_vm2 = vcmp.eq.s32.totalorder %v1916_v27, %v1593_v17  ;;  %v3398_v27 = vmov 0 }
  0x75   :  { %vm431_vm15 = vmand %vm3375_vm9, %vm3374_vm7 }
  0x76   :  { %vm1419_vm12 = vmpackc.low %vm431_vm15, %vm430_vm5  ;;  %vm3385_vm15 = vcmp.eq.s32.totalorder %v2065_v10, %v1585_v11  ;;  %vm3386_vm5 = vcmp.eq.s32.totalorder %v2128_v63, %v1602_v23 }
  0x77   :  { %1420 = vmatpush3.bf16.msk.msra.mxu1 %vm1419_vm12, %v3287_v62  ;;  %vm3376_vm6 = vmmov %vm3372_vm0  ;;  %vm3384_vm12 = vcmp.eq.s32.totalorder %v2126_v57, %v1602_v23 }
  0x78   :  { %vm2596_vm14 = vmand %vm3377_vm3, %vm3376_vm6  ;;  %vm3388_vm3 = vcmp.eq.s32.totalorder %v2172_v8, %v1602_v23 }
  0x79   :  { %v3379_v1 = vsel %vm2596_vm14, 4294967295, %v3378_v1  ;;  %vm3380_vm1 = vmmov %vm3374_vm7  ;;  %vm3387_vm7 = vcmp.eq.s32.totalorder %v2067_v12, %v1585_v11 }
  0x7a   :  { %vm2606_vm0 = vmand %vm3381_vm2, %vm3380_vm1  ;;  %vm3389_vm1 = vcmp.eq.s32.totalorder %v2108_v2, %v1585_v11 }
  0x7b   :  { %v3383_v16 = vsel %vm2606_vm0, 4294967295, %v3382_v16  ;;  %vm249_vm8 = vmand %vm3385_vm15, %vm3384_vm12  ;;  %vm3390_vm12 = vcmp.eq.s32.totalorder %v2174_v44, %v1602_v23  ;;  %vm3391_vm15 = vcmp.eq.s32.totalorder %v2110_v9, %v1585_v11 }
  0x7c   :  { %vm250_vm9 = vmand %vm3387_vm7, %vm3386_vm5  ;;  %vm3393_vm5 = vcmp.eq.s32.totalorder %v2108_v2, %v1593_v17 }
  0x7d   :  { %vm1389_vm6 = vmpackc.low %vm250_vm9, %vm249_vm8 }
  0x7e   :  { %1390 = vmatprep.subr.msk.bf16.mxu0 %vm1389_vm6, %v3287_v62  ;;  %vm233_vm2 = vmand %vm3389_vm1, %vm3388_vm3  ;;  %vm3397_vm6 = vcmp.eq.s32.totalorder %v2110_v9, %v1593_v17 }
  0x7f   :  { %vm234_vm0 = vmand %vm3391_vm15, %vm3390_vm12 }
  0x80   :  { %vm1391_vm14 = vmpackc.low %vm234_vm0, %vm233_vm2  ;;  %vm3401_vm0 = vcmp.eq.s32.totalorder %v2065_v10, %v1585_v11  ;;  %vm3402_vm2 = vcmp.eq.s32.totalorder %v2128_v63, %v1665_v32 }
  0x81   :  { %1392 = vmatpush3.bf16.msk.msra.mxu0 %vm1391_vm14, %v3287_v62  ;;  %vm3392_vm8 = vmmov %vm3388_vm3  ;;  %vm3400_vm14 = vcmp.eq.s32.totalorder %v2126_v57, %v1665_v32 }
  0x82   :  { %vm2642_vm7 = vmand %vm3393_vm5, %vm3392_vm8  ;;  %vm3404_vm5 = vcmp.eq.s32.totalorder %v2172_v8, %v1665_v32  ;;  %v3442_v8 = vmov 0 }
  0x83   :  { %v3395_v25 = vsel %vm2642_vm7, 4294967295, %v3394_v25  ;;  %vm3396_vm9 = vmmov %vm3390_vm12  ;;  %vm3403_vm12 = vcmp.eq.s32.totalorder %v2067_v12, %v1585_v11 }
  0x84   :  { %vm2652_vm3 = vmand %vm3397_vm6, %vm3396_vm9  ;;  %vm3405_vm9 = vcmp.eq.s32.totalorder %v2108_v2, %v1585_v11 }
  0x85   :  { %v3399_v27 = vsel %vm2652_vm3, 4294967295, %v3398_v27  ;;  %vm448_vm1 = vmand %vm3401_vm0, %vm3400_vm14  ;;  %vm3406_vm14 = vcmp.eq.s32.totalorder %v2174_v44, %v1665_v32  ;;  %vm3407_vm0 = vcmp.eq.s32.totalorder %v2110_v9, %v1585_v11  ;;  %v3446_v44 = vmov 0 }
  0x86   :  { %vm449_vm15 = vmand %vm3403_vm12, %vm3402_vm2  ;;  %vm3409_vm2 = vcmp.eq.s32.totalorder %v2108_v2, %v1593_v17  ;;  %v3426_v2 = vmov 0 }
  0x87   :  { %vm1421_vm8 = vmpackc.low %vm449_vm15, %vm448_vm1 }
  0x88   :  { %1422 = vmatprep.subr.msk.bf16.mxu1 %vm1421_vm8, %v3287_v62  ;;  %vm432_vm6 = vmand %vm3405_vm9, %vm3404_vm5  ;;  %vm3413_vm8 = vcmp.eq.s32.totalorder %v2110_v9, %v1593_v17  ;;  %v3430_v9 = vmov 0 }
  0x89   :  { %vm433_vm3 = vmand %vm3407_vm0, %vm3406_vm14 }
  0x8a   :  { %vm1423_vm7 = vmpackc.low %vm433_vm3, %vm432_vm6  ;;  %vm3417_vm3 = vcmp.eq.s32.totalorder %v2112_v0, %v1585_v11  ;;  %vm3418_vm6 = vcmp.eq.s32.totalorder %v2219_v6, %v1602_v23 }
  0x8b   :  { %1424 = vmatpush3.bf16.msk.msra.mxu1 %vm1423_vm7, %v3287_v62  ;;  %vm3408_vm1 = vmmov %vm3404_vm5  ;;  %vm3416_vm7 = vcmp.eq.s32.totalorder %v2217_v58, %v1602_v23 }
  0x8c   :  { %vm2688_vm12 = vmand %vm3409_vm2, %vm3408_vm1  ;;  %vm3420_vm2 = vcmp.eq.s32.totalorder %v2261_v24, %v1602_v23 }
  0x8d   :  { %v3411_v3 = vsel %vm2688_vm12, 4294967295, %v3410_v3  ;;  %vm3412_vm15 = vmmov %vm3406_vm14  ;;  %vm3419_vm14 = vcmp.eq.s32.totalorder %v2114_v30, %v1585_v11 }
  0x8e   :  { %vm2698_vm5 = vmand %vm3413_vm8, %vm3412_vm15  ;;  %vm3421_vm15 = vcmp.eq.s32.totalorder %v2131_v59, %v1585_v11 }
  0x8f   :  { %v3415_v4 = vsel %vm2698_vm5, 4294967295, %v3414_v4  ;;  %vm251_vm9 = vmand %vm3417_vm3, %vm3416_vm7  ;;  %vm3422_vm7 = vcmp.eq.s32.totalorder %v2264_v15, %v1602_v23  ;;  %vm3423_vm3 = vcmp.eq.s32.totalorder %v2134_v50, %v1585_v11 }
  0x90   :  { %vm252_vm0 = vmand %vm3419_vm14, %vm3418_vm6  ;;  %vm3425_vm6 = vcmp.eq.s32.totalorder %v2131_v59, %v1593_v17 }
  0x91   :  { %vm1393_vm1 = vmpackc.low %vm252_vm0, %vm251_vm9 }
  0x92   :  { %1394 = vmatprep.subr.msk.bf16.mxu0 %vm1393_vm1, %v3287_v62  ;;  %vm235_vm8 = vmand %vm3421_vm15, %vm3420_vm2  ;;  %vm3429_vm1 = vcmp.eq.s32.totalorder %v2134_v50, %v1593_v17 }
  0x93   :  { %vm236_vm5 = vmand %vm3423_vm3, %vm3422_vm7 }
  0x94   :  { %vm1395_vm12 = vmpackc.low %vm236_vm5, %vm235_vm8  ;;  %vm3433_vm5 = vcmp.eq.s32.totalorder %v2112_v0, %v1585_v11  ;;  %vm3434_vm8 = vcmp.eq.s32.totalorder %v2219_v6, %v1665_v32 }
  0x95   :  { %1396 = vmatpush3.bf16.msk.msra.mxu0 %vm1395_vm12, %v3287_v62  ;;  %vm3424_vm9 = vmmov %vm3420_vm2  ;;  %vm3432_vm12 = vcmp.eq.s32.totalorder %v2217_v58, %v1665_v32 }
  0x96   :  { %vm2734_vm14 = vmand %vm3425_vm6, %vm3424_vm9  ;;  %vm3436_vm6 = vcmp.eq.s32.totalorder %v2261_v24, %v1665_v32 }
  0x97   :  { %v3427_v2 = vsel %vm2734_vm14, 4294967295, %v3426_v2  ;;  %vm3428_vm0 = vmmov %vm3422_vm7  ;;  %vm3435_vm7 = vcmp.eq.s32.totalorder %v2114_v30, %v1585_v11 }
  0x98   :  { %vm2744_vm2 = vmand %vm3429_vm1, %vm3428_vm0  ;;  %vm3437_vm0 = vcmp.eq.s32.totalorder %v2131_v59, %v1585_v11 }
  0x99   :  { %v3431_v9 = vsel %vm2744_vm2, 4294967295, %v3430_v9  ;;  %vm450_vm15 = vmand %vm3433_vm5, %vm3432_vm12  ;;  %vm3438_vm12 = vcmp.eq.s32.totalorder %v2264_v15, %v1665_v32  ;;  %vm3439_vm5 = vcmp.eq.s32.totalorder %v2134_v50, %v1585_v11 }
  0x9a   :  { %vm451_vm3 = vmand %vm3435_vm7, %vm3434_vm8  ;;  %vm3441_vm8 = vcmp.eq.s32.totalorder %v2131_v59, %v1593_v17  ;;  %v2830_v59 = vld [vmem:[#allocation2] sm:$0xff] }
  0x9b   :  { %vm1425_vm9 = vmpackc.low %vm451_vm3, %vm450_vm15 }
  0x9c   :  { %1426 = vmatprep.subr.msk.bf16.mxu1 %vm1425_vm9, %v3287_v62  ;;  %vm434_vm1 = vmand %vm3437_vm0, %vm3436_vm6  ;;  %vm3445_vm9 = vcmp.eq.s32.totalorder %v2134_v50, %v1593_v17 }
  0x9d   :  { %vm435_vm2 = vmand %vm3439_vm5, %vm3438_vm12 }
  0x9e   :  { %vm1427_vm14 = vmpackc.low %vm435_vm2, %vm434_vm1  ;;  %vm3449_vm2 = vcmp.eq.s32.totalorder %v2306_v43, %v1585_v11  ;;  %vm3450_vm1 = vcmp.eq.s32.totalorder %v2366_v33, %v1602_v23 }
  0x9f   :  { %1428 = vmatpush3.bf16.msk.msra.mxu1 %vm1427_vm14, %v3287_v62  ;;  %vm3440_vm15 = vmmov %vm3436_vm6  ;;  %vm3448_vm14 = vcmp.eq.s32.totalorder %v2364_v20, %v1602_v23 }
  0xa0   :  { %vm2780_vm7 = vmand %vm3441_vm8, %vm3440_vm15  ;;  %vm3452_vm8 = vcmp.eq.s32.totalorder %v2412_v40, %v1602_v23 }
  0xa1   :  { %v3443_v8 = vsel %vm2780_vm7, 4294967295, %v3442_v8  ;;  %vm3444_vm3 = vmmov %vm3438_vm12  ;;  %vm3451_vm12 = vcmp.eq.s32.totalorder %v2308_v35, %v1585_v11 }
  0xa2   :  { %vm2790_vm6 = vmand %vm3445_vm9, %vm3444_vm3  ;;  %vm3453_vm3 = vcmp.eq.s32.totalorder %v2345_v53, %v1585_v11 }
  0xa3   :  { %v3447_v44 = vsel %vm2790_vm6, 4294967295, %v3446_v44  ;;  %vm253_vm0 = vmand %vm3449_vm2, %vm3448_vm14  ;;  %vm3454_vm14 = vcmp.eq.s32.totalorder %v2414_v28, %v1602_v23  ;;  %vm3455_vm2 = vcmp.eq.s32.totalorder %v2347_v52, %v1585_v11 }
  0xa4   :  { %vm254_vm5 = vmand %vm3451_vm12, %vm3450_vm1  ;;  %vm3457_vm1 = vcmp.eq.s32.totalorder %v2345_v53, %v1593_v17 }
  0xa5   :  { %vm1397_vm15 = vmpackc.low %vm254_vm5, %vm253_vm0 }
  0xa6   :  { %1398 = vmatprep.subr.msk.bf16.mxu0 %vm1397_vm15, %v3287_v62  ;;  %vm237_vm9 = vmand %vm3453_vm3, %vm3452_vm8 }
  0xa7   :  { %vm238_vm6 = vmand %vm3455_vm2, %vm3454_vm14 }
  0xa8   :  { %vm1399_vm7 = vmpackc.low %vm238_vm6, %vm237_vm9  ;;  %vm3461_vm6 = vcmp.eq.s32.totalorder %v2347_v52, %v1593_v17  ;;  %vm3466_vm9 = vcmp.eq.s32.totalorder %v2366_v33, %v1665_v32 }
  0xa9   :  { %1400 = vmatpush3.bf16.msk.msra.mxu0 %vm1399_vm7, %v3287_v62  ;;  %vm3456_vm0 = vmmov %vm3452_vm8  ;;  %vm3464_vm7 = vcmp.eq.s32.totalorder %v2364_v20, %v1665_v32  ;;  %vm3465_vm8 = vcmp.eq.s32.totalorder %v2306_v43, %v1585_v11 }
  0xaa   :  { %vm2826_vm12 = vmand %vm3457_vm1, %vm3456_vm0  ;;  %vm3468_vm1 = vcmp.eq.s32.totalorder %v2412_v40, %v1665_v32 }
  0xab   :  { %vm3460_vm5 = vmmov %vm3454_vm14  ;;  %vm3467_vm14 = vcmp.eq.s32.totalorder %v2308_v35, %v1585_v11 }
  0xac   :  { %vm2838_vm15 = vmand %vm3461_vm6, %vm3460_vm5  ;;  %384 = vmatmul.mubr.f32.vlgmr.msra.gmra.mrb[0].mxu0 %v2830_v59  ;;  %vm3469_vm5 = vcmp.eq.s32.totalorder %v2345_v53, %v1585_v11 }
  0xad   :  { %vm452_vm3 = vmand %vm3465_vm8, %vm3464_vm7  ;;  %782 = vmatprep.mubr.f32.mxu0 %v1623_v26  ;;  %vm3470_vm7 = vcmp.eq.s32.totalorder %v2414_v28, %v1665_v32  ;;  %vm3471_vm8 = vcmp.eq.s32.totalorder %v2347_v52, %v1585_v11 }
  0xae   :  { %vm453_vm2 = vmand %vm3467_vm14, %vm3466_vm9 }
  0xaf   :  { %vm1429_vm0 = vmpackc.low %vm453_vm2, %vm452_vm3  ;;  %vm3473_vm2 = vcmp.eq.s32.totalorder %v2345_v53, %v1593_v17  ;;  %v3503_v53 = vld [vmem:[#allocation13_spill] sm:$0xff] }
  0xb0   :  { %1430 = vmatprep.subr.msk.bf16.mxu1 %vm1429_vm0, %v3287_v62  ;;  %vm436_vm6 = vmand %vm3469_vm5, %vm3468_vm1  ;;  %vm3477_vm5 = vcmp.eq.s32.totalorder %v2347_v52, %v1593_v17  ;;  %v3501_v52 = vld [vmem:[#allocation18_spill] sm:$0xff] }
  0xb1   :  { %vm437_vm9 = vmand %vm3471_vm8, %vm3470_vm7 }
  0xb2   :  { %vm1431_vm14 = vmpackc.low %vm437_vm9, %vm436_vm6  ;;  %vm3480_vm9 = vnez %v3223_v51  ;;  %v3499_v51 = vld [vmem:[#allocation17_spill] sm:$0xff] }
  0xb3   :  { %1432 = vmatpush3.bf16.msk.msra.mxu1 %vm1431_vm14, %v3287_v62  ;;  %vm3472_vm3 = vmmov %vm3468_vm1  ;;  %vm3481_vm14 = vnez %v3228_v56  ;;  %v3507_v56 = vld [vmem:[#allocation14_spill] sm:$0xff] }
  0xb4   :  { %vm2876_vm0 = vmand %vm3473_vm2, %vm3472_vm3 }
  0xb5   :  { %vm3476_vm1 = vmmov %vm3470_vm7 }
  0xb6   :  { %vm2886_vm7 = vmand %vm3477_vm5, %vm3476_vm1  ;;  %583 = vmatmul.mubr.f32.vlgmr.msra.gmra.mrb[0].mxu1 %v2830_v59  ;;  %vm3488_vm5 = vcmp.eq.s32.totalorder %v3487_v34, %v1602_v23 }
  0xb7   :  { %vm1433_vm6 = vmpackc.low %vm1675_vm4, %vm1656_vm13  ;;  %949 = vmatprep.mubr.f32.mxu1 %v1623_v26  ;;  %vm3482_vm13 = vnez %v3234_v5  ;;  %vm3483_vm4 = vnez %v3237_v7  ;;  %v3489_v26 = vld [vmem:[#allocation8_spill] sm:$0xff]  ;;  %v3511_v7 = vld [vmem:[#allocation19_spill] sm:$0xff] }
  0xb8   :  { %1434 = vmatprep.subr.msk.bf16.mxu0 %vm1433_vm6, %v3287_v62  ;;  %vm1435_vm8 = vmpackc.low %vm1728_vm11, %vm1716_vm10  ;;  %vm3485_vm10 = vcmp.eq.s32.totalorder %v3484_v31, %v1602_v23  ;;  %vm3486_vm11 = vcmp.eq.s32.totalorder %v1647_v29, %v1593_v17  ;;  %vm3490_vm6 = vcmp.eq.s32.totalorder %v3489_v26, %v1593_v17  ;;  %v3505_v29 = vld [vmem:[#allocation11_spill] sm:$0xff]  ;;  %v3509_v5 = vld [vmem:[#allocation12_spill] sm:$0xff] }
  0xb9   :  { %1436 = vmatpush3.bf16.msk.msra.mxu0 %vm1435_vm8, %v3287_v62  ;;  %vm1465_vm3 = vmpackc.low %vm3481_vm14, %vm3480_vm9  ;;  %vm3492_vm14 = vnez %v3491_v41 }
  0xba   :  { %1466 = vmatprep.subr.msk.bf16.mxu1 %vm1465_vm3, %v3287_v62  ;;  %vm1467_vm2 = vmpackc.low %vm3483_vm4, %vm3482_vm13  ;;  %vm3494_vm3 = vnez %v3493_v42  ;;  %vm3495_vm4 = vcmp.eq.s32.totalorder %v3484_v31, %v1665_v32 }
  0xbb   :  { %1468 = vmatpush3.bf16.msk.msra.mxu1 %vm1467_vm2, %v3287_v62  ;;  %vm640_vm1 = vmand %vm3486_vm11, %vm3485_vm10 }
  0xbc   :  { %vm641_vm8 = vmand %vm3490_vm6, %vm3488_vm5 }
  0xbd   :  { %vm1437_vm9 = vmpackc.low %vm641_vm8, %vm640_vm1  ;;  %vm3500_vm8 = vnez %v3499_v51 }
  0xbe   :  { %1438 = vmatprep.subr.msk.bf16.mxu0 %vm1437_vm9, %v3287_v62  ;;  %vm1439_vm13 = vmpackc.low %vm3494_vm3, %vm3492_vm14  ;;  %vm3502_vm9 = vnez %v3501_v52  ;;  %vm3504_vm3 = vcmp.eq.s32.totalorder %v3503_v53, %v1602_v23 }
  0xbf   :  { %1440 = vmatpush3.bf16.msk.msra.mxu0 %vm1439_vm13, %v3287_v62  ;;  %vm3496_vm2 = vmmov %vm3486_vm11  ;;  %vm3497_vm11 = vcmp.eq.s32.totalorder %v3487_v34, %v1665_v32  ;;  %vm3506_vm13 = vcmp.eq.s32.totalorder %v3505_v29, %v1593_v17 }
  0xc0   :  { %vm807_vm10 = vmand %vm3496_vm2, %vm3495_vm4  ;;  %vm3508_vm2 = vcmp.eq.s32.totalorder %v3507_v56, %v1602_v23 }
  0xc1   :  { %vm3498_vm1 = vmmov %vm3490_vm6 }
  0xc2   :  { %vm808_vm5 = vmand %vm3498_vm1, %vm3497_vm11 }
  0xc3   :  { %vm1469_vm6 = vmpackc.low %vm808_vm5, %vm807_vm10  ;;  %vm3510_vm10 = vcmp.eq.s32.totalorder %v3509_v5, %v1593_v17  ;;  %vm3512_vm5 = vnez %v3511_v7 }
  0xc4   :  { %1470 = vmatprep.subr.msk.bf16.mxu1 %vm1469_vm6, %v3287_v62  ;;  %vm1471_vm14 = vmpackc.low %vm3502_vm9, %vm3500_vm8  ;;  %vm3514_vm6 = vnez %v3513_v39  ;;  %vm3515_vm9 = vcmp.eq.s32.totalorder %v3503_v53, %v1665_v32 }
  0xc5   :  { %1472 = vmatpush3.bf16.msk.msra.mxu1 %vm1471_vm14, %v3287_v62  ;;  %vm642_vm4 = vmand %vm3506_vm13, %vm3504_vm3 }
  0xc6   :  { %vm643_vm11 = vmand %vm3510_vm10, %vm3508_vm2 }
  0xc7   :  { %vm1441_vm1 = vmpackc.low %vm643_vm11, %vm642_vm4  ;;  %vm3519_vm11 = vnez %v3319_v21 }
  0xc8   :  { %1442 = vmatprep.subr.msk.bf16.mxu0 %vm1441_vm1, %v3287_v62  ;;  %vm1443_vm8 = vmpackc.low %vm3514_vm6, %vm3512_vm5  ;;  %vm3520_vm1 = vnez %v3323_v47  ;;  %vm3521_vm6 = vcmp.eq.s32.totalorder %v1958_v37, %v1602_v23 }
  0xc9   :  { %1444 = vmatpush3.bf16.msk.msra.mxu0 %vm1443_vm8, %v3287_v62  ;;  %vm3516_vm14 = vmmov %vm3506_vm13  ;;  %vm3517_vm13 = vcmp.eq.s32.totalorder %v3507_v56, %v1665_v32  ;;  %vm3522_vm8 = vcmp.eq.s32.totalorder %v1830_v60, %v1593_v17 }
  0xca   :  { %vm809_vm3 = vmand %vm3516_vm14, %vm3515_vm9  ;;  %vm3523_vm14 = vcmp.eq.s32.totalorder %v1961_v38, %v1602_v23 }
  0xcb   :  { %vm3518_vm4 = vmmov %vm3510_vm10 }
  0xcc   :  { %vm810_vm2 = vmand %vm3518_vm4, %vm3517_vm13 }
  0xcd   :  { %vm1473_vm10 = vmpackc.low %vm810_vm2, %vm809_vm3  ;;  %vm3524_vm3 = vcmp.eq.s32.totalorder %v1833_v61, %v1593_v17  ;;  %vm3525_vm2 = vnez %v3337_v36 }
  0xce   :  { %1474 = vmatprep.subr.msk.bf16.mxu1 %vm1473_vm10, %v3287_v62  ;;  %vm1475_vm5 = vmpackc.low %vm3520_vm1, %vm3519_vm11  ;;  %vm3526_vm10 = vnez %v3341_v22  ;;  %vm3527_vm1 = vcmp.eq.s32.totalorder %v1958_v37, %v1665_v32 }
  0xcf   :  { %1476 = vmatpush3.bf16.msk.msra.mxu1 %vm1475_vm5, %v3287_v62  ;;  %vm644_vm9 = vmand %vm3522_vm8, %vm3521_vm6 }
  0xd0   :  { %vm645_vm13 = vmand %vm3524_vm3, %vm3523_vm14 }
  0xd1   :  { %vm1445_vm4 = vmpackc.low %vm645_vm13, %vm644_vm9  ;;  %vm3531_vm13 = vnez %v3348_v45 }
  0xd2   :  { %1446 = vmatprep.subr.msk.bf16.mxu0 %vm1445_vm4, %v3287_v62  ;;  %vm1447_vm11 = vmpackc.low %vm3526_vm10, %vm3525_vm2  ;;  %vm3532_vm4 = vnez %v3351_v46  ;;  %vm3533_vm10 = vcmp.eq.s32.totalorder %v1982_v54, %v1602_v23 }
  0xd3   :  { %1448 = vmatpush3.bf16.msk.msra.mxu0 %vm1447_vm11, %v3287_v62  ;;  %vm3528_vm5 = vmmov %vm3522_vm8  ;;  %vm3529_vm8 = vcmp.eq.s32.totalorder %v1961_v38, %v1665_v32  ;;  %vm3534_vm11 = vcmp.eq.s32.totalorder %v1892_v18, %v1593_v17 }
  0xd4   :  { %vm811_vm6 = vmand %vm3528_vm5, %vm3527_vm1  ;;  %vm3535_vm5 = vcmp.eq.s32.totalorder %v1984_v55, %v1602_v23 }
  0xd5   :  { %vm3530_vm9 = vmmov %vm3524_vm3 }
  0xd6   :  { %vm812_vm14 = vmand %vm3530_vm9, %vm3529_vm8 }
  0xd7   :  { %vm1477_vm3 = vmpackc.low %vm812_vm14, %vm811_vm6  ;;  %vm3536_vm6 = vcmp.eq.s32.totalorder %v1894_v19, %v1593_v17  ;;  %vm3537_vm14 = vnez %v3363_v13 }
  0xd8   :  { %1478 = vmatprep.subr.msk.bf16.mxu1 %vm1477_vm3, %v3287_v62  ;;  %vm1479_vm2 = vmpackc.low %vm3532_vm4, %vm3531_vm13  ;;  %vm3538_vm3 = vnez %v3367_v14  ;;  %vm3539_vm4 = vcmp.eq.s32.totalorder %v1982_v54, %v1665_v32 }
  0xd9   :  { %1480 = vmatpush3.bf16.msk.msra.mxu1 %vm1479_vm2, %v3287_v62  ;;  %vm646_vm1 = vmand %vm3534_vm11, %vm3533_vm10 }
  0xda   :  { %vm647_vm8 = vmand %vm3536_vm6, %vm3535_vm5 }
  0xdb   :  { %vm1449_vm9 = vmpackc.low %vm647_vm8, %vm646_vm1  ;;  %vm3543_vm8 = vnez %v3379_v1 }
  0xdc   :  { %1450 = vmatprep.subr.msk.bf16.mxu0 %vm1449_vm9, %v3287_v62  ;;  %vm1451_vm13 = vmpackc.low %vm3538_vm3, %vm3537_vm14  ;;  %vm3544_vm9 = vnez %v3383_v16  ;;  %vm3545_vm3 = vcmp.eq.s32.totalorder %v2126_v57, %v1602_v23 }
  0xdd   :  { %1452 = vmatpush3.bf16.msk.msra.mxu0 %vm1451_vm13, %v3287_v62  ;;  %vm3540_vm2 = vmmov %vm3534_vm11  ;;  %vm3541_vm11 = vcmp.eq.s32.totalorder %v1984_v55, %v1665_v32  ;;  %vm3546_vm13 = vcmp.eq.s32.totalorder %v2065_v10, %v1593_v17 }
  0xde   :  { %vm813_vm10 = vmand %vm3540_vm2, %vm3539_vm4  ;;  %vm3547_vm2 = vcmp.eq.s32.totalorder %v2128_v63, %v1602_v23 }
  0xdf   :  { %vm3542_vm1 = vmmov %vm3536_vm6 }
  0xe0   :  { %vm814_vm5 = vmand %vm3542_vm1, %vm3541_vm11 }
  0xe1   :  { %vm1481_vm6 = vmpackc.low %vm814_vm5, %vm813_vm10  ;;  %vm3548_vm10 = vcmp.eq.s32.totalorder %v2067_v12, %v1593_v17  ;;  %vm3549_vm5 = vnez %v3395_v25 }
  0xe2   :  { %1482 = vmatprep.subr.msk.bf16.mxu1 %vm1481_vm6, %v3287_v62  ;;  %vm1483_vm14 = vmpackc.low %vm3544_vm9, %vm3543_vm8  ;;  %vm3550_vm6 = vnez %v3399_v27  ;;  %vm3551_vm9 = vcmp.eq.s32.totalorder %v2126_v57, %v1665_v32 }
  0xe3   :  { %1484 = vmatpush3.bf16.msk.msra.mxu1 %vm1483_vm14, %v3287_v62  ;;  %vm648_vm4 = vmand %vm3546_vm13, %vm3545_vm3 }
  0xe4   :  { %vm649_vm11 = vmand %vm3548_vm10, %vm3547_vm2 }
  0xe5   :  { %vm1453_vm1 = vmpackc.low %vm649_vm11, %vm648_vm4  ;;  %vm3555_vm11 = vnez %v3411_v3 }
  0xe6   :  { %1454 = vmatprep.subr.msk.bf16.mxu0 %vm1453_vm1, %v3287_v62  ;;  %vm1455_vm8 = vmpackc.low %vm3550_vm6, %vm3549_vm5  ;;  %vm3556_vm1 = vnez %v3415_v4  ;;  %vm3557_vm6 = vcmp.eq.s32.totalorder %v2217_v58, %v1602_v23 }
  0xe7   :  { %1456 = vmatpush3.bf16.msk.msra.mxu0 %vm1455_vm8, %v3287_v62  ;;  %vm3552_vm14 = vmmov %vm3546_vm13  ;;  %vm3553_vm13 = vcmp.eq.s32.totalorder %v2128_v63, %v1665_v32  ;;  %vm3558_vm8 = vcmp.eq.s32.totalorder %v2112_v0, %v1593_v17 }
  0xe8   :  { %vm815_vm3 = vmand %vm3552_vm14, %vm3551_vm9  ;;  %vm3559_vm14 = vcmp.eq.s32.totalorder %v2219_v6, %v1602_v23 }
  0xe9   :  { %vm3554_vm4 = vmmov %vm3548_vm10 }
  0xea   :  { %vm816_vm2 = vmand %vm3554_vm4, %vm3553_vm13 }
  0xeb   :  { %vm1485_vm10 = vmpackc.low %vm816_vm2, %vm815_vm3  ;;  %vm3560_vm3 = vcmp.eq.s32.totalorder %v2114_v30, %v1593_v17  ;;  %vm3561_vm2 = vnez %v3427_v2 }
  0xec   :  { %1486 = vmatprep.subr.msk.bf16.mxu1 %vm1485_vm10, %v3287_v62  ;;  %vm1487_vm5 = vmpackc.low %vm3556_vm1, %vm3555_vm11  ;;  %vm3562_vm10 = vnez %v3431_v9  ;;  %vm3563_vm1 = vcmp.eq.s32.totalorder %v2217_v58, %v1665_v32 }
  0xed   :  { %1488 = vmatpush3.bf16.msk.msra.mxu1 %vm1487_vm5, %v3287_v62  ;;  %vm650_vm9 = vmand %vm3558_vm8, %vm3557_vm6 }
  0xee   :  { %vm651_vm13 = vmand %vm3560_vm3, %vm3559_vm14 }
  0xef   :  { %vm1457_vm4 = vmpackc.low %vm651_vm13, %vm650_vm9  ;;  %vm3567_vm13 = vnez %v3443_v8 }
  0xf0   :  { %1458 = vmatprep.subr.msk.bf16.mxu0 %vm1457_vm4, %v3287_v62  ;;  %vm1459_vm11 = vmpackc.low %vm3562_vm10, %vm3561_vm2  ;;  %vm3568_vm4 = vnez %v3447_v44  ;;  %vm3569_vm10 = vcmp.eq.s32.totalorder %v2364_v20, %v1602_v23 }
  0xf1   :  { %1460 = vmatpush3.bf16.msk.msra.mxu0 %vm1459_vm11, %v3287_v62  ;;  %vm3564_vm5 = vmmov %vm3558_vm8  ;;  %vm3565_vm8 = vcmp.eq.s32.totalorder %v2219_v6, %v1665_v32  ;;  %vm3570_vm11 = vcmp.eq.s32.totalorder %v2306_v43, %v1593_v17 }
  0xf2   :  { %vm817_vm6 = vmand %vm3564_vm5, %vm3563_vm1  ;;  %vm3571_vm5 = vcmp.eq.s32.totalorder %v2366_v33, %v1602_v23 }
  0xf3   :  { %vm3566_vm9 = vmmov %vm3560_vm3 }
  0xf4   :  { %vm818_vm14 = vmand %vm3566_vm9, %vm3565_vm8 }
  0xf5   :  { %vm1489_vm3 = vmpackc.low %vm818_vm14, %vm817_vm6  ;;  %vm3572_vm6 = vcmp.eq.s32.totalorder %v2308_v35, %v1593_v17 }
  0xf6   :  { %1490 = vmatprep.subr.msk.bf16.mxu1 %vm1489_vm3, %v3287_v62  ;;  %vm1491_vm2 = vmpackc.low %vm3568_vm4, %vm3567_vm13  ;;  %vm3573_vm3 = vcmp.eq.s32.totalorder %v2364_v20, %v1665_v32 }
  0xf7   :  { %1492 = vmatpush3.bf16.msk.msra.mxu1 %vm1491_vm2, %v3287_v62  ;;  %vm652_vm1 = vmand %vm3570_vm11, %vm3569_vm10  ;;  %vm3575_vm2 = vcmp.eq.s32.totalorder %v2366_v33, %v1665_v32 }
  0xf8   :  { %vm653_vm8 = vmand %vm3572_vm6, %vm3571_vm5 }
  0xf9   :  { %vm1461_vm9 = vmpackc.low %vm653_vm8, %vm652_vm1 }
  0xfa   :  { %1462 = vmatprep.subr.msk.bf16.mxu0 %vm1461_vm9, %v3287_v62  ;;  %vm1463_vm14 = vmpackc.low %vm2838_vm15, %vm2826_vm12  ;;  %vm956_vm15 = vcmask 523264  }
  0xfb   :  { %1464 = vmatpush3.bf16.msk.msra.mxu0 %vm1463_vm14, %v3287_v62  ;;  %vm3574_vm13 = vmmov %vm3570_vm11 }
  0xfc   :  { %vm819_vm4 = vmand %vm3574_vm13, %vm3573_vm3 }
  0xfd   :  { %vm3576_vm10 = vmmov %vm3572_vm6 }
  0xfe   :  { %vm820_vm11 = vmand %vm3576_vm10, %vm3575_vm2  ;;  %783 = vmatmul.mubr.f32.vlgmr.msra.gmra.mrb[2].mxu0 %v2830_v59 }
  0xff   :  { %vm1493_vm1 = vmpackc.low %vm820_vm11, %vm819_vm4 }
 0x100   :  { %1494 = vmatprep.subr.msk.bf16.mxu1 %vm1493_vm1, %v3287_v62  ;;  %vm1495_vm12 = vmpackc.low %vm2886_vm7, %vm2876_vm0 }
 0x101   :  { %1496 = vmatpush3.bf16.msk.msra.mxu1 %vm1495_vm12, %v3287_v62 }
 0x104   :  { %950 = vmatmul.mubr.f32.vlgmr.msra.gmra.mrb[2].mxu1 %v2830_v59 }
 0x17f   :  { %v1261_v23 = vpop.f32.mrb[0].mxu0 }
 0x180   :  { %v1262_v30 = vpop.f32.mrb[1].mxu0 }
 0x181   :  { %v1263_v32 = vadd.f32 %v1262_v30, %v1261_v23 }
 0x189   :  { %v1296_v33 = vpop.f32.mrb[0].mxu1 }
 0x18a   :  { %v1297_v17 = vpop.f32.mrb[1].mxu1 }
 0x18b   :  { %v1298_v60 = vadd.f32 %v1297_v17, %v1296_v33 }
 0x18d   :  { %v588_v61 = vmax.f32 %v1263_v32, %v1298_v60 }
 0x1d1   :  { %v1331_v18 = vpop.f32.mrb[2].mxu0 }
 0x1d2   :  { %v1332_v19 = vpop.f32.mrb[3].mxu0 }
 0x1d3   :  { %v1333_v20 = vadd.f32 %v1332_v19, %v1331_v18 }
 0x1d5   :  { %v788_v37 = vmax.f32 %v588_v61, %v1333_v20 }
 0x1d7   :  { %v1366_v38 = vpop.f32.mrb[2].mxu1 }
 0x1d8   :  { %v1367_v54 = vpop.f32.mrb[3].mxu1 }
 0x1d9   :  { %v1368_v55 = vadd.f32 %v1367_v54, %v1366_v38 }
 0x1db   :  { %v955_v0 = vmax.f32 %v788_v37, %v1368_v55 }
 0x1dd   :  { %957 = vst.msk [vmem:[#allocation5] sm:$0xff] %vm956_vm15, %v955_v0 }
 0x1de   :  { %1533 = shalt.err (!%p1530_p12)
}
 0x1df   :  { %s1534_s22 = scalar_lea.hbm %s3179_s1, 128 }
 0x1e0   :  { %p1535_p13 = scmp.ne.s32.totalorder %s3179_s1, %s1534_s22  ;;  %p1538_p0 = scmp.lt.u32.totalorder %s1534_s22, %s3179_s1 }
 0x1e2   :  { %p1540_p1 = pnand %p1538_p0, %p1535_p13 }
 0x1e4   :  { %1543 = shalt.err (!%p1540_p1)
}
 0x1e5   :  { %967 = dma.vmem_to_hbm [thread:$0]  %s965_s18, 128, %s3179_s1, [#allocation4]  }
 0x1e6   :  { %1546 = dma.done.wait [#allocation4], 128  }
 0x1e7   :  { %1547 = vsyncadd [#allocation4], 4294967168 }
 0x1e8   :  { %971 = vsyncpa [#allocation3], 1 }
 0x1e9   :  { %972 = vsyncpa [#allocation4], 1 }

</bundles_post_ra>
